<compile_context>
chip_gen: v5e
topology: v5e:2x2
jax: 0.10.0
libtpu: 0.0.40
codegen_flags: <defaults>
</compile_context>

<pallas_src>
import functools

import jax
import jax.numpy as jnp
from jax import lax
from jax.experimental import pallas as pl
from jax.experimental.pallas import tpu as pltpu

_EPS = 1e-8            # torch.nn.CosineSimilarity default eps
_EPS2 = _EPS * _EPS    # clamp on the squared norms -> max(||v||, eps) per operand (ATen behavior)

_LANE = 128            # lane granularity for minor block dims
_SUBLANE = 16          # sublane granularity (16 also covers bf16/f16 packing)
_MAX_TM = 512
_MAX_TN = 512


def _round_up(a, b):
    return (a + b - 1) // b * b


# ---------------------------------------------------------------------------
# Path 1: outer-product ("SimCSE") form:  x2d:(M,H), y2d:(N,H) -> (M,N)
#   out[i, j] = <x_i, y_j> * (1/(temp*max(||x_i||,eps))) * (1/max(||y_j||,eps))
# ---------------------------------------------------------------------------
def _outer_cos_single_k_kernel(x_ref, yt_ref, ix_ref, iy_ref, o_ref, *, precision):
    # Single contraction step: no accumulator scratch round-trip.
    num = lax.dot_general(
        x_ref[...], yt_ref[...],
        dimension_numbers=(((1,), (0,)), ((), ())),
        preferred_element_type=jnp.float32,
        precision=precision)
    o_ref[...] = (num * ix_ref[...] * iy_ref[...]).astype(o_ref.dtype)


def _outer_cos_multi_k_kernel(x_ref, yt_ref, ix_ref, iy_ref, o_ref, acc_ref, *,
                              precision, k_actual, tk, mask_k):
    k = pl.program_id(2)

    @pl.when(k == 0)
    def _():
        acc_ref[...] = jnp.zeros_like(acc_ref)

    x = x_ref[...]
    yt = yt_ref[...]
    if mask_k:  # static: only emitted when H % tk != 0 (zero the K-tail garbage)
        koff = k * tk
        lane = lax.broadcasted_iota(jnp.int32, x.shape, 1)
        x = jnp.where(koff + lane < k_actual, x, jnp.zeros_like(x))
        sub = lax.broadcasted_iota(jnp.int32, yt.shape, 0)
        yt = jnp.where(koff + sub < k_actual, yt, jnp.zeros_like(yt))

    acc_ref[...] += lax.dot_general(
        x, yt,
        dimension_numbers=(((1,), (0,)), ((), ())),
        preferred_element_type=jnp.float32,
        precision=precision)

    @pl.when(k == pl.num_programs(2) - 1)
    def _():
        o_ref[...] = (acc_ref[...] * ix_ref[...] * iy_ref[...]).astype(o_ref.dtype)


def _pick_outer_tiles(M, N, H, kcap):
    if H <= kcap:
        tk, nk, mask_k = H, 1, False        # block covers full K dim -> no tail mask
    else:
        tk = kcap
        nk = pl.cdiv(H, tk)
        mask_k = (H % tk) != 0
    tm = min(_round_up(M, _SUBLANE), _MAX_TM)
    tn = min(_round_up(N, _LANE), _MAX_TN)
    # v7x has two TensorCores: ensure >=2 "parallel" grid blocks when the problem is
    # big enough to split (free on single-core v5e/v6e).
    if pl.cdiv(M, tm) * pl.cdiv(N, tn) == 1:
        if M >= 2 * _SUBLANE:
            tm = _round_up(pl.cdiv(M, 2), _SUBLANE)
        elif N >= 2 * _LANE:
            tn = _round_up(pl.cdiv(N, 2), _LANE)
    return tm, tn, tk, nk, mask_k


def _cosine_outer(x2d, y2d, temp, out_dtype, precise):
    M, H = x2d.shape
    N = y2d.shape[0]

    # Per-row inverse norms, clamped per operand (max(||v||, eps), current ATen behavior;
    # also avoids overflow of ||x||^2*||y||^2). Computed once outside the kernel; 1/temp
    # is folded into the x-side factor so the kernel epilogue is two VPU multiplies.
    # TODO(synk): for single-tile problems this prepass could be fused into the matmul
    # kernel to avoid re-reading x/y once; negligible for large B.
    xf = x2d.astype(jnp.float32)
    yf = y2d.astype(jnp.float32)
    inv_x = (lax.rsqrt(jnp.maximum(jnp.sum(xf * xf, axis=-1), _EPS2)) / temp).reshape(M, 1)
    inv_y = lax.rsqrt(jnp.maximum(jnp.sum(yf * yf, axis=-1), _EPS2)).reshape(1, N)

    if precise:
        xc, ytc = xf, yf.T                      # f32 operands, multi-pass MXU
        precision = lax.Precision.HIGHEST
        kcap = 1024
    else:
        xc = x2d.astype(jnp.bfloat16)           # single-pass MXU, half HBM/VMEM traffic
        ytc = y2d.astype(jnp.bfloat16).T        # one-time K-major copy (fused with cast)
        precision = None
        kcap = 2048

    tm, tn, tk, nk, mask_k = _pick_outer_tiles(M, N, H, kcap)
    grid = (pl.cdiv(M, tm), pl.cdiv(N, tn), nk)

    if nk == 1:
        kernel = functools.partial(_outer_cos_single_k_kernel, precision=precision)
        scratch = []
    else:
        kernel = functools.partial(_outer_cos_multi_k_kernel, precision=precision,
                                   k_actual=H, tk=tk, mask_k=mask_k)
        scratch = [pltpu.VMEM((tm, tn), jnp.float32)]

    return pl.pallas_call(
        kernel,
        out_shape=jax.ShapeDtypeStruct((M, N), out_dtype),
        grid_spec=pltpu.PrefetchScalarGridSpec(
            num_scalar_prefetch=0,
            grid=grid,
            in_specs=[
                pl.BlockSpec((tm, tk), lambda i, j, k: (i, k)),   # x rows
                pl.BlockSpec((tk, tn), lambda i, j, k: (k, j)),   # y^T, K-major
                pl.BlockSpec((tm, 1), lambda i, j, k: (i, 0)),    # 1/(temp*||x_i||)
                pl.BlockSpec((1, tn), lambda i, j, k: (0, j)),    # 1/||y_j||
            ],
            out_specs=pl.BlockSpec((tm, tn), lambda i, j, k: (i, j)),
            scratch_shapes=scratch,
        ),
        compiler_params=pltpu.CompilerParams(
            dimension_semantics=("parallel", "parallel", "arbitrary"),
            vmem_limit_bytes=32 * 1024 * 1024),
    )(xc, ytc, inv_x, inv_y)


# ---------------------------------------------------------------------------
# Path 2: general row-wise fallback (same-shape / shared-axis broadcasts).
# ---------------------------------------------------------------------------
def _rowwise_cos_kernel(x_ref, y_ref, o_ref, *, inv_temp):
    x = x_ref[...].astype(jnp.float32)
    y = y_ref[...].astype(jnp.float32)
    w12 = jnp.sum(x * y, axis=-1, keepdims=True)
    w1 = jnp.sum(x * x, axis=-1, keepdims=True)
    w2 = jnp.sum(y * y, axis=-1, keepdims=True)
    r = lax.rsqrt(jnp.maximum(w1, _EPS2)) * lax.rsqrt(jnp.maximum(w2, _EPS2))
    o_ref[...] = (w12 * r * inv_temp).astype(o_ref.dtype)


def _cosine_rowwise(x, y, temp, out_dtype):
    full_shape = jnp.broadcast_shapes(x.shape, y.shape)
    H = full_shape[-1]
    out_batch = full_shape[:-1]

    # TODO(synk): shared-axis broadcasts could be expressed in the BlockSpec index_map
    # instead of materializing them; same-shape calls (the common fallback case) pay
    # nothing here.
    xb = x if x.shape == full_shape else jnp.broadcast_to(x, full_shape)
    yb = y if y.shape == full_shape else jnp.broadcast_to(y, full_shape)
    xb = xb.reshape(-1, H)
    yb = yb.reshape(-1, H)
    R = xb.shape[0]

    itemsize = max(jnp.dtype(xb.dtype).itemsize, jnp.dtype(yb.dtype).itemsize)
    # ~2 MiB per input tile -> <= ~8 MiB double-buffered; fits every generation's
    # scoped-VMEM default (v5e: 16 MiB, v6e/v7x: 32 MiB).
    budget_rows = max(_SUBLANE, (2 << 20) // max(H * itemsize, 1))
    row_tile = min(_round_up(R, _SUBLANE), _round_up(budget_rows, _SUBLANE), 8192)
    if pl.cdiv(R, row_tile) == 1 and R >= 2 * _SUBLANE:
        row_tile = _round_up(pl.cdiv(R, 2), _SUBLANE)   # >=2 blocks for v7x's 2 cores

    kernel = functools.partial(_rowwise_cos_kernel, inv_temp=float(1.0 / temp))
    out = pl.pallas_call(
        kernel,
        out_shape=jax.ShapeDtypeStruct((R, 1), out_dtype),
        grid_spec=pltpu.PrefetchScalarGridSpec(
            num_scalar_prefetch=0,
            grid=(pl.cdiv(R, row_tile),),
            in_specs=[pl.BlockSpec((row_tile, H), lambda i: (i, 0)),
                      pl.BlockSpec((row_tile, H), lambda i: (i, 0))],
            out_specs=pl.BlockSpec((row_tile, 1), lambda i: (i, 0)),
        ),
        compiler_params=pltpu.CompilerParams(
            dimension_semantics=("parallel",),
            vmem_limit_bytes=32 * 1024 * 1024),
    )(xb, yb)
    # TODO(synk): output is lane-width-1 (masked stores); a lane-dense (1, row_tile)
    # layout needs an in-kernel sublane->lane relayout and is left out of this
    # rarely-hit fallback (output bytes are ~1/(2H) of the input bytes here).
    return out.reshape(out_batch)


# ---------------------------------------------------------------------------
# Dispatch
# ---------------------------------------------------------------------------
def _detect_outer(x, y):
    """If cos(x, y) factors into an outer product over rows (e.g. SimCSE x:(B,1,H) vs
    y:(1,B,H)), return (x2d, y2d, swap); else None."""
    if x.ndim < 1 or y.ndim < 1:
        return None
    if x.shape[-1] != y.shape[-1]:
        return None
    H = x.shape[-1]
    nb = max(x.ndim, y.ndim) - 1
    if nb < 1:
        return None
    xb = (1,) * (nb - (x.ndim - 1)) + tuple(x.shape[:-1])
    yb = (1,) * (nb - (y.ndim - 1)) + tuple(y.shape[:-1])
    if any(a > 1 and b > 1 for a, b in zip(xb, yb)):
        return None  # shared non-trivial batch axis -> elementwise, not outer
    x_axes = [i for i, a in enumerate(xb) if a > 1]
    y_axes = [i for i, b in enumerate(yb) if b > 1]
    x2d = x.reshape(-1, H)
    y2d = y.reshape(-1, H)
    if not x_axes or not y_axes or max(x_axes) < min(y_axes):
        return x2d, y2d, False          # output rows follow x, columns follow y
    if max(y_axes) < min(x_axes):
        return x2d, y2d, True           # output rows follow y, columns follow x
    return None


@functools.partial(jax.jit, static_argnums=(2,), static_argnames=("precise",))
def similarity(x, y, temp, *, precise=False):
    """cosine_similarity(x, y, dim=-1) / temp with PyTorch broadcasting semantics.

    precise=False (default): bf16 single-pass MXU numerator, f32 accumulation/denominator.
    precise=True: f32 operands with Precision.HIGHEST (reference-accurate, slower).
    """
    out_dtype = jnp.result_type(x, y)
    if not jnp.issubdtype(out_dtype, jnp.floating):
        out_dtype = jnp.float32
    out_batch = jnp.broadcast_shapes(x.shape, y.shape)[:-1]

    outer = _detect_outer(x, y)
    if outer is not None:
        x2d, y2d, swap = outer
        if swap:
            # Cosine similarity is symmetric: swap args instead of transposing the
            # (B,B) output in HBM.
            out2d = _cosine_outer(y2d, x2d, temp, out_dtype, precise)
        else:
            out2d = _cosine_outer(x2d, y2d, temp, out_dtype, precise)
        return out2d.reshape(out_batch)

    return _cosine_rowwise(x, y, temp, out_dtype)


# ---------------------------------------------------------------------------
# References & self-test
# ---------------------------------------------------------------------------
def _reference(x, y, temp):
    xf, yf = jnp.broadcast_arrays(x.astype(jnp.float32), y.astype(jnp.float32))
    w12 = jnp.sum(xf * yf, axis=-1)
    w1 = jnp.sum(xf * xf, axis=-1)
    w2 = jnp.sum(yf * yf, axis=-1)
    r = lax.rsqrt(jnp.maximum(w1, _EPS2)) * lax.rsqrt(jnp.maximum(w2, _EPS2))
    return w12 * r / temp


def _reference_bf16_numerator(x, y, temp):
    # Same as _reference, but with the numerator inputs truncated to bf16 -- matches the
    # fast kernel's single-pass MXU numerics (products in bf16, f32 accumulation).
    xf, yf = jnp.broadcast_arrays(x.astype(jnp.float32), y.astype(jnp.float32))
    xb = xf.astype(jnp.bfloat16).astype(jnp.float32)
    yb = yf.astype(jnp.bfloat16).astype(jnp.float32)
    w12 = jnp.sum(xb * yb, axis=-1)
    w1 = jnp.sum(xf * xf, axis=-1)
    w2 = jnp.sum(yf * yf, axis=-1)
    r = lax.rsqrt(jnp.maximum(w1, _EPS2)) * lax.rsqrt(jnp.maximum(w2, _EPS2))
    return w12 * r / temp


if __name__ == "__main__":
    keys = jax.random.split(jax.random.PRNGKey(0), 11)
    temp = 0.05  # Similarity(temp=0.05)

    def max_abs_diff(a, b):
        return float(jnp.max(jnp.abs(a.astype(jnp.float32) - b.astype(jnp.float32))))

    def check_fast(out, x, y, label):
        ref = _reference(x, y, temp)
        refb = _reference_bf16_numerator(x, y, temp)
        assert out.shape == ref.shape, (label, out.shape, ref.shape)
        # Tight check vs the bf16-numerator reference (same numerics as the kernel).
        assert jnp.allclose(out, refb, atol=2e-3, rtol=2e-3), (label, max_abs_diff(out, refb))
        # Loose sanity check vs the exact f32 reference.
        assert jnp.allclose(out, ref, atol=1e-1, rtol=2e-2), (label, max_abs_diff(out, ref))

    # 1) SimCSE-style call: x (B,1,H) vs y (1,B,H) -> (B,B) similarity matrix.
    B, H = 8, 32
    x1 = jax.random.normal(keys[0], (B, 1, H), dtype=jnp.float32)
    y1 = jax.random.normal(keys[1], (1, B, H), dtype=jnp.float32)
    s1 = jax.block_until_ready(similarity(x1, y1, temp))
    assert s1.shape == (B, B), s1.shape
    check_fast(s1, x1, y1, "simcse-small")

    # 1b) precise mode (f32 MXU passes) must match the f32 reference tightly.
    s1p = jax.block_until_ready(similarity(x1, y1, temp, precise=True))
    r1 = _reference(x1, y1, temp)
    assert jnp.allclose(s1p, r1, atol=1e-3, rtol=1e-3), max_abs_diff(s1p, r1)

    # 2) Unaligned multi-tile shape: cdiv grids, tail blocks, megacore M split.
    M2, N2, H2 = 300, 290, 200
    x2 = jax.random.normal(keys[2], (M2, 1, H2), dtype=jnp.float32)
    y2 = jax.random.normal(keys[3], (1, N2, H2), dtype=jnp.float32)
    s2 = jax.block_until_ready(similarity(x2, y2, temp))
    assert s2.shape == (M2, N2), s2.shape
    check_fast(s2, x2, y2, "simcse-unaligned")

    # 3) Large hidden dim: multi-step K accumulation + in-kernel K-tail masking.
    M3, N3, H3 = 64, 192, 2304
    x3 = jax.random.normal(keys[4], (M3, 1, H3), dtype=jnp.float32)
    y3 = jax.random.normal(keys[5], (1, N3, H3), dtype=jnp.float32)
    s3 = jax.block_until_ready(similarity(x3, y3, temp))
    assert s3.shape == (M3, N3), s3.shape
    check_fast(s3, x3, y3, "simcse-multi-k")

    # 4) Swapped broadcast (y on rows): symmetric dispatch, no HBM output transpose.
    x4 = jax.random.normal(keys[6], (1, 6, H), dtype=jnp.float32)
    y4 = jax.random.normal(keys[7], (5, 1, H), dtype=jnp.float32)
    s4 = jax.block_until_ready(similarity(x4, y4, temp))
    assert s4.shape == (5, 6), s4.shape
    check_fast(s4, x4, y4, "simcse-swapped")

    # 5) Same-shape (elementwise) call -> row-wise fallback (f32 compute).
    x5 = jax.random.normal(keys[8], (4, 7, 32), dtype=jnp.float32)
    y5 = jax.random.normal(keys[9], (4, 7, 32), dtype=jnp.float32)
    s5 = jax.block_until_ready(similarity(x5, y5, temp))
    r5 = _reference(x5, y5, temp)
    assert s5.shape == (4, 7), s5.shape
    assert jnp.allclose(s5, r5, atol=1e-4, rtol=1e-4), max_abs_diff(s5, r5)

    # 6) Shared-axis broadcast -> row-wise fallback with broadcasting.
    y6 = jax.random.normal(keys[10], (1, 7, 32), dtype=jnp.float32)
    s6 = jax.block_until_ready(similarity(x5, y6, temp))
    r6 = _reference(x5, y6, temp)
    assert s6.shape == (4, 7), s6.shape
    assert jnp.allclose(s6, r6, atol=1e-4, rtol=1e-4), max_abs_diff(s6, r6)

    print("KERNEL_OK")
</pallas_src>

<mosaic_0001>
module attributes {stable_mosaic.version = 11 : i64} {
  func.func @_outer_cos_single_k_kernel(%arg0: i32, %arg1: i32, %arg2: i32, %arg3: memref<16x32xbf16, #tpu.memory_space<vmem>>, %arg4: memref<32x128xbf16, #tpu.memory_space<vmem>>, %arg5: memref<16x1xf32, #tpu.memory_space<vmem>>, %arg6: memref<1x128xf32, #tpu.memory_space<vmem>>, %arg7: memref<16x128xf32, #tpu.memory_space<vmem>>) attributes {dimension_semantics = [#tpu.dimension_semantics<parallel>, #tpu.dimension_semantics<parallel>, #tpu.dimension_semantics<arbitrary>], iteration_bounds = array<i64: 1, 1, 1>, scalar_prefetch = 0 : i64, scratch_operands = 0 : i64, tpu.core_type = #tpu.core_type<tc>, window_params = [{transform_indices = @transform_0, window_bounds = array<i64: 16, 32>}, {transform_indices = @transform_1, window_bounds = array<i64: 32, 128>}, {transform_indices = @transform_2, window_bounds = array<i64: 16, 1>}, {transform_indices = @transform_3, window_bounds = array<i64: 1, 128>}, {transform_indices = @transform_4, window_bounds = array<i64: 16, 128>}]} {
    %c0 = arith.constant 0 : index
    %c0_0 = arith.constant 0 : index
    %0 = vector.load %arg3[%c0, %c0_0] : memref<16x32xbf16, #tpu.memory_space<vmem>>, vector<16x32xbf16>
    %c0_1 = arith.constant 0 : index
    %c0_2 = arith.constant 0 : index
    %1 = vector.load %arg4[%c0_1, %c0_2] : memref<32x128xbf16, #tpu.memory_space<vmem>>, vector<32x128xbf16>
    %cst = arith.constant dense<0.000000e+00> : vector<16x128xf32>
    %2 = tpu.matmul %0, %1, %cst {dimension_numbers = #tpu.dot_dimension_numbers<[1], [0], [0], [1], [0, 0, 1, 1], [], []>} : vector<16x32xbf16>, vector<32x128xbf16>, vector<16x128xf32> -> vector<16x128xf32>
    %c0_3 = arith.constant 0 : index
    %c0_4 = arith.constant 0 : index
    %3 = vector.load %arg5[%c0_3, %c0_4] : memref<16x1xf32, #tpu.memory_space<vmem>>, vector<16x1xf32>
    %4 = vector.broadcast %3 : vector<16x1xf32> to vector<16x128xf32>
    %5 = arith.mulf %2, %4 : vector<16x128xf32>
    %c0_5 = arith.constant 0 : index
    %c0_6 = arith.constant 0 : index
    %6 = vector.load %arg6[%c0_5, %c0_6] : memref<1x128xf32, #tpu.memory_space<vmem>>, vector<1x128xf32>
    %7 = vector.broadcast %6 : vector<1x128xf32> to vector<16x128xf32>
    %8 = arith.mulf %5, %7 : vector<16x128xf32>
    %c0_7 = arith.constant 0 : index
    %c0_8 = arith.constant 0 : index
    %9 = vector.load %arg7[%c0_7, %c0_8] : memref<16x128xf32, #tpu.memory_space<vmem>>, vector<16x128xf32>
    tpu.vector_store %arg7[%c0_7, %c0_8], %8 {strides = array<i32>} : memref<16x128xf32, #tpu.memory_space<vmem>>, vector<16x128xf32>,
    return
  }
  func.func @transform_0(%arg0: i32, %arg1: i32, %arg2: i32) -> (i32, i32) {
    %c0_i32 = arith.constant 0 : i32
    return %arg0, %arg2 : i32, i32
  }
  func.func @transform_1(%arg0: i32, %arg1: i32, %arg2: i32) -> (i32, i32) {
    %c0_i32 = arith.constant 0 : i32
    return %arg2, %arg1 : i32, i32
  }
  func.func @transform_2(%arg0: i32, %arg1: i32, %arg2: i32) -> (i32, i32) {
    %c0_i32 = arith.constant 0 : i32
    %c0_i32_0 = arith.constant 0 : i32
    return %arg0, %c0_i32 : i32, i32
  }
  func.func @transform_3(%arg0: i32, %arg1: i32, %arg2: i32) -> (i32, i32) {
    %c0_i32 = arith.constant 0 : i32
    %c0_i32_0 = arith.constant 0 : i32
    return %c0_i32, %arg1 : i32, i32
  }
  func.func @transform_4(%arg0: i32, %arg1: i32, %arg2: i32) -> (i32, i32) {
    %c0_i32 = arith.constant 0 : i32
    return %arg0, %arg1 : i32, i32
  }
}

</mosaic_0001>

<bundles_post_ra>
// kernel: similarity.1
= control target key start
LH: loop header
LB: loop body
LE: loop exit
PB: predicated region body
PF: predicated region fallthrough
CT: control target
= control target key end

     0   :  { %9 = vsyncpa [#allocation3], 0  ;;  %v148_v1 = vmov 0   ;;  %vm42_vm0 = vcmask 261120   ;;  %s198_s0 = inlined_call_operand.vmem [shape: bf16[8,32], index: 0, kind: input, shape index: {}]   ;;  %s199_s1 = inlined_call_operand.vmem [shape: bf16[32,8], index: 1, kind: input, shape index: {}]   ;;  %s200_s2 = inlined_call_operand.vmem [shape: f32[8,1], index: 2, kind: input, shape index: {}]   ;;  %s201_s3 = inlined_call_operand.vmem [shape: f32[1,8], index: 3, kind: input, shape index: {}]   ;;  %s202_s4 = inlined_call_operand.hbm [shape: f32[8,8], index: 4, kind: output, shape index: {}]  }
   0x1   :  { %v115_v0 = vld [vmem:[%s199_s1 + $0x8] sm:$0xff]  ;;  %120 = vset.pattern.permute.xlu0 %v148_v1  ;;  %v60_v2 = vld [vmem:[%s200_s2] sm:$0xff] }
   0x2   :  { %52 = vmatpush.bf16.msra.mxu0 %v115_v0  ;;  %v114_v3 = vld [vmem:[%s199_s1] sm:$0xff]  ;;  %64 = vperm.xlu0 %120, %v60_v2   ;;  %v61_v5 = vld [vmem:[%s200_s2 + $0x8] sm:$0xff] }
   0x3   :  { %v113_v4 = vld [vmem:[%s198_s0] sm:$0xff] }
   0x4   :  { %v121_v7 = vld [vmem:[%s201_s3] ss:$0 sm:$0xff] }
   0x6   :  { %53 = vmatpush.bf16.msra.mxu0 %v114_v3 }
   0x9   :  { %112 = vmatmul.msk.bf16.vlgmr.msra.gmra.mxu0 %vm42_vm0, %v113_v4 }
   0xa   :  { %69 = vperm.xlu0 %120, %v61_v5  }
  0x74   :  { %v65_v6 = vpop.permute.xlu0 %64 }
  0x7c   :  { %v70_v11 = vpop.permute.xlu0 %69 }
  0x86   :  { %v55_v8 = vpop.f32.mrf.mxu0 }
  0x87   :  { %v72_v9 = vmul.f32 %v65_v6, %v55_v8 }
  0x89   :  { %v78_v10 = vmul.f32 %v121_v7, %v72_v9 }
  0x8b   :  { %80 = vst [vmem:[#allocation2] sm:$0xff] %v78_v10 }
  0x8e   :  { %v57_v12 = vpop.f32.mrf.mxu0 }
  0x8f   :  { %v73_v13 = vmul.f32 %v70_v11, %v57_v12 }
  0x91   :  { %v79_v14 = vmul.f32 %v121_v7, %v73_v13 }
  0x93   :  { %81 = vst [vmem:[#allocation2 + $0x8] sm:$0xff] %v79_v14 }
  0x94   :  { %85 = vsyncadd [#allocation3], 128  ;;  %s88_s2 = sshll.u32 %s202_s4, 4  ;;  %s149_s27 = smov [#allocation2]   ;;  %s89_s2 = int_to_ptr.hbm [resolvable:$true] %s88_s2 }
  0x95   :  { %s86_s28 = sshll.u32 %s149_s27, 4  ;;  %s150_s29 = smov 128   ;;  %s87_s28 = int_to_ptr.vmem [resolvable:$true] %s86_s28 }
  0x96   :  { %s151_s3 = smov 8  }
  0x97   :  { %94 = dma.vmem_to_hbm [thread:$0]  %s87_s28, 128, %s89_s2, [#allocation3], %s150_s29, %s150_s29, %s151_s3  }
  0x98   :  { %146 = dma.done.wait [#allocation3], 256  }
  0x99   :  { %147 = vsyncadd [#allocation3], 4294967040 }
  0x9a   :  { %99 = vsyncpa [#allocation3], 1 }

</bundles_post_ra>
